<compile_context>
chip_gen: v7x
topology: tpu7x:2x2x1
jax: 0.10.0
libtpu: 0.0.40
codegen_flags: <defaults>
</compile_context>

<pallas_src>
import jax
import jax.numpy as jnp
from jax import lax
from jax.experimental import pallas as pl
from jax.experimental.pallas import tpu as pltpu

# ------------------------------------------------------------------ small demo config
SEQ = 8          # L  (sequence length; dim 0 of the module input)
BATCH = 2        # N  (batch; dim 1 of the module input)
EMBED = 32       # E
NUM_HEADS = 4
HEAD_DIM = EMBED // NUM_HEADS


# ------------------------------------------------------------------ the fused kernel
def _mha_kernel(x_ref, wqkv_ref, bqkv_ref, wo_ref, bo_ref, o_ref):
    # Block shapes (per grid step (n, h)):
    #   x_ref    : (1, L, E)        bf16   (resident across the head sweep)
    #   wqkv_ref : (3, 1, E, hd)    bf16   (head h's q/k/v projection columns)
    #   bqkv_ref : (3, 1, 1, hd)    f32
    #   wo_ref   : (1, hd, E)       bf16   (head h's rows of the output projection)
    #   bo_ref   : (1, E)           f32
    #   o_ref    : (1, L, E)        f32    (accumulated over the head axis)
    x = x_ref[0]                                              # (L, E) bf16

    # Per-head projections; 1/sqrt(head_dim) already folded into the q weights/bias.
    q = jnp.dot(x, wqkv_ref[0, 0], preferred_element_type=jnp.float32) + bqkv_ref[0, 0]
    k = jnp.dot(x, wqkv_ref[1, 0], preferred_element_type=jnp.float32) + bqkv_ref[1, 0]
    v = jnp.dot(x, wqkv_ref[2, 0], preferred_element_type=jnp.float32) + bqkv_ref[2, 0]

    # Scores: q @ k^T (bf16 into the MXU, f32 out). Softmax stats stay f32.
    s = lax.dot_general(q.astype(jnp.bfloat16), k.astype(jnp.bfloat16),
                        (((1,), (1,)), ((), ())),
                        preferred_element_type=jnp.float32)   # (L, L)
    s = s - jnp.max(s, axis=-1, keepdims=True)
    p = jnp.exp(s)
    p = p * pl.reciprocal(jnp.sum(p, axis=-1, keepdims=True), approx=True)

    o = jnp.dot(p.astype(jnp.bfloat16), v.astype(jnp.bfloat16),
                preferred_element_type=jnp.float32)           # (L, hd)

    # This head's slice of the output projection; accumulate over the head axis
    # directly in the resident output block (no head concat needed).
    part = jnp.dot(o.astype(jnp.bfloat16), wo_ref[0],
                   preferred_element_type=jnp.float32)        # (L, E)

    @pl.when(pl.program_id(1) == 0)
    def _():
        o_ref[0] = part + bo_ref[...]

    @pl.when(pl.program_id(1) > 0)
    def _():
        o_ref[0] += part


# ------------------------------------------------------------------ wrapper
def mha_forward(x_lne, kp):
    """x_lne: (L, N, E) like the PyTorch module input; returns (L, N, E) f32."""
    l, n, e = x_lne.shape
    h = NUM_HEADS
    hd = e // h

    # Layout plumbing: batch-major activations, bf16 MXU operands.
    # (BlockSpec index_maps cannot express an axis permutation; at realistic sizes
    #  keep activations batch-major end-to-end so this XLA transpose disappears.)
    x_nle = jnp.transpose(x_lne, (1, 0, 2)).astype(jnp.bfloat16)

    out_nle = pl.pallas_call(
        _mha_kernel,
        grid=(n, h),
        in_specs=[
            pl.BlockSpec((1, l, e), lambda i, j: (i, 0, 0)),       # x: per batch, resident over heads
            pl.BlockSpec((3, 1, e, hd), lambda i, j: (0, j, 0, 0)),  # per-head qkv weights
            pl.BlockSpec((3, 1, 1, hd), lambda i, j: (0, j, 0, 0)),  # per-head qkv biases
            pl.BlockSpec((1, hd, e), lambda i, j: (j, 0, 0)),        # per-head out-proj rows
            pl.BlockSpec((1, e), lambda i, j: (0, 0)),               # out-proj bias (constant block)
        ],
        out_specs=pl.BlockSpec((1, l, e), lambda i, j: (i, 0, 0)),   # accumulator over the head axis
        out_shape=jax.ShapeDtypeStruct((n, l, e), jnp.float32),
        compiler_params=pltpu.CompilerParams(
            # batch blocks are independent -> shardable across v7x's 2 TensorCores;
            # head axis accumulates into the output block -> must stay sequential.
            dimension_semantics=("parallel", "arbitrary"),
            # Explicit scoped-VMEM budget: resident blocks are only a few KiB even
            # after tile padding + double buffering; 4 MiB is ample headroom on
            # every generation (v5e/v6e 128 MiB, v7x 64 MiB physical VMEM).
            vmem_limit_bytes=4 * 1024 * 1024,
        ),
    )(x_nle, kp['wqkv_h'], kp['bqkv_h'], kp['wo_h'], kp['bo'])

    return jnp.transpose(out_nle, (1, 0, 2))


# ------------------------------------------------------------------ parameters
def init_raw_params(key):
    """Torch-style parameters, stored pre-transposed for right-multiplication."""
    ks = jax.random.split(key, 8)
    std = 0.05

    def rnd(k, shape):
        return std * jax.random.normal(k, shape, jnp.float32)

    return dict(
        wq=rnd(ks[0], (EMBED, EMBED)), bq=rnd(ks[1], (EMBED,)),
        wk=rnd(ks[2], (EMBED, EMBED)), bk=rnd(ks[3], (EMBED,)),
        wv=rnd(ks[4], (EMBED, EMBED)), bv=rnd(ks[5], (EMBED,)),
        wo=rnd(ks[6], (EMBED, EMBED)), bo=rnd(ks[7], (EMBED,)),
    )


def prepare_kernel_params(raw):
    """One-time weight prep: per-head layout, attention scale folded into q, bf16 MXU weights."""
    scale = 1.0 / float(HEAD_DIM) ** 0.5

    def per_head_w(w):    # (E, E) -> (H, E, hd): [h] = columns h*hd:(h+1)*hd
        return jnp.transpose(w.reshape(EMBED, NUM_HEADS, HEAD_DIM), (1, 0, 2))

    def per_head_b(b):    # (E,) -> (H, 1, hd)
        return b.reshape(NUM_HEADS, 1, HEAD_DIM)

    wqkv_h = jnp.stack([per_head_w(raw['wq'] * scale),
                        per_head_w(raw['wk']),
                        per_head_w(raw['wv'])], axis=0).astype(jnp.bfloat16)   # (3, H, E, hd)
    bqkv_h = jnp.stack([per_head_b(raw['bq'] * scale),
                        per_head_b(raw['bk']),
                        per_head_b(raw['bv'])], axis=0).astype(jnp.float32)    # (3, H, 1, hd)
    # out = sum_h o_h @ wo[h*hd:(h+1)*hd, :] + bo
    wo_h = raw['wo'].reshape(NUM_HEADS, HEAD_DIM, EMBED).astype(jnp.bfloat16)  # (H, hd, E)
    bo = raw['bo'].reshape(1, EMBED).astype(jnp.float32)
    return dict(wqkv_h=wqkv_h, bqkv_h=bqkv_h, wo_h=wo_h, bo=bo)


# ------------------------------------------------------------------ pure-JAX reference
def mha_reference(x, raw):
    """Standard nn.MultiheadAttention math (batch_first=False), eval mode, f32."""
    l, n, e = x.shape
    q = x @ raw['wq'] + raw['bq']
    k = x @ raw['wk'] + raw['bk']
    v = x @ raw['wv'] + raw['bv']
    qh = q.reshape(l, n, NUM_HEADS, HEAD_DIM)
    kh = k.reshape(l, n, NUM_HEADS, HEAD_DIM)
    vh = v.reshape(l, n, NUM_HEADS, HEAD_DIM)
    s = jnp.einsum('lnhd,mnhd->nhlm', qh, kh) / (HEAD_DIM ** 0.5)
    p = jax.nn.softmax(s, axis=-1)
    o = jnp.einsum('nhlm,mnhd->lnhd', p, vh).reshape(l, n, e)
    return o @ raw['wo'] + raw['bo']


# ------------------------------------------------------------------ main
if __name__ == "__main__":
    key = jax.random.PRNGKey(0)
    pkey, xkey = jax.random.split(key)
    raw = init_raw_params(pkey)
    kparams = prepare_kernel_params(raw)
    x = jax.random.normal(xkey, (SEQ, BATCH, EMBED), jnp.float32)

    out = jax.jit(mha_forward)(x, kparams)
    jax.block_until_ready(out)

    assert out.shape == (SEQ, BATCH, EMBED) and out.dtype == jnp.float32

    ref = mha_reference(x, raw)
    max_err = float(jnp.max(jnp.abs(out - ref)))
    assert jnp.allclose(out, ref, atol=1e-2, rtol=1e-2), max_err

    print("KERNEL_OK")
</pallas_src>

<mosaic_0001>
module attributes {stable_mosaic.version = 11 : i64} {
  func.func @_mha_kernel(%arg0: i32, %arg1: i32, %arg2: memref<1x8x32xbf16, #tpu.memory_space<vmem>>, %arg3: memref<3x1x32x8xbf16, #tpu.memory_space<vmem>>, %arg4: memref<3x1x1x8xf32, #tpu.memory_space<vmem>>, %arg5: memref<1x8x32xbf16, #tpu.memory_space<vmem>>, %arg6: memref<1x32xf32, #tpu.memory_space<vmem>>, %arg7: memref<1x8x32xf32, #tpu.memory_space<vmem>>) attributes {dimension_semantics = [#tpu.dimension_semantics<parallel>, #tpu.dimension_semantics<arbitrary>], iteration_bounds = array<i64: 2, 4>, scalar_prefetch = 0 : i64, scratch_operands = 0 : i64, tpu.core_type = #tpu.core_type<tc>, window_params = [{transform_indices = @transform_0, window_bounds = array<i64: 1, 8, 32>}, {transform_indices = @transform_1, window_bounds = array<i64: 3, 1, 32, 8>}, {transform_indices = @transform_2, window_bounds = array<i64: 3, 1, 1, 8>}, {transform_indices = @transform_3, window_bounds = array<i64: 1, 8, 32>}, {pipeline_mode = #tpu.pipeline_mode<synchronous>, transform_indices = @transform_4, window_bounds = array<i64: 1, 32>}, {transform_indices = @transform_5, window_bounds = array<i64: 1, 8, 32>}]} {
    %c0 = arith.constant 0 : index
    %c0_0 = arith.constant 0 : index
    %c0_1 = arith.constant 0 : index
    %0 = vector.load %arg2[%c0, %c0_0, %c0_1] : memref<1x8x32xbf16, #tpu.memory_space<vmem>>, vector<1x8x32xbf16>
    %1 = vector.shape_cast %0 : vector<1x8x32xbf16> to vector<8x32xbf16>
    %c0_2 = arith.constant 0 : index
    %c0_3 = arith.constant 0 : index
    %c0_4 = arith.constant 0 : index
    %c0_5 = arith.constant 0 : index
    %2 = vector.load %arg3[%c0_2, %c0_3, %c0_4, %c0_5] : memref<3x1x32x8xbf16, #tpu.memory_space<vmem>>, vector<1x1x32x8xbf16>
    %3 = vector.shape_cast %2 : vector<1x1x32x8xbf16> to vector<32x8xbf16>
    %cst = arith.constant dense<0.000000e+00> : vector<8x8xf32>
    %4 = tpu.matmul %1, %3, %cst {dimension_numbers = #tpu.dot_dimension_numbers<[1], [0], [0], [1], [0, 0, 1, 1], [], []>} : vector<8x32xbf16>, vector<32x8xbf16>, vector<8x8xf32> -> vector<8x8xf32>
    %c0_6 = arith.constant 0 : index
    %c0_7 = arith.constant 0 : index
    %c0_8 = arith.constant 0 : index
    %c0_9 = arith.constant 0 : index
    %5 = vector.load %arg4[%c0_6, %c0_7, %c0_8, %c0_9] : memref<3x1x1x8xf32, #tpu.memory_space<vmem>>, vector<1x1x1x8xf32>
    %6 = vector.shape_cast %5 : vector<1x1x1x8xf32> to vector<1x8xf32>
    %7 = vector.broadcast %6 : vector<1x8xf32> to vector<8x8xf32>
    %8 = arith.addf %4, %7 : vector<8x8xf32>
    %c1 = arith.constant 1 : index
    %c0_10 = arith.constant 0 : index
    %c0_11 = arith.constant 0 : index
    %c0_12 = arith.constant 0 : index
    %9 = vector.load %arg3[%c1, %c0_10, %c0_11, %c0_12] : memref<3x1x32x8xbf16, #tpu.memory_space<vmem>>, vector<1x1x32x8xbf16>
    %10 = vector.shape_cast %9 : vector<1x1x32x8xbf16> to vector<32x8xbf16>
    %cst_13 = arith.constant dense<0.000000e+00> : vector<8x8xf32>
    %11 = tpu.matmul %1, %10, %cst_13 {dimension_numbers = #tpu.dot_dimension_numbers<[1], [0], [0], [1], [0, 0, 1, 1], [], []>} : vector<8x32xbf16>, vector<32x8xbf16>, vector<8x8xf32> -> vector<8x8xf32>
    %c1_14 = arith.constant 1 : index
    %c0_15 = arith.constant 0 : index
    %c0_16 = arith.constant 0 : index
    %c0_17 = arith.constant 0 : index
    %12 = vector.load %arg4[%c1_14, %c0_15, %c0_16, %c0_17] : memref<3x1x1x8xf32, #tpu.memory_space<vmem>>, vector<1x1x1x8xf32>
    %13 = vector.shape_cast %12 : vector<1x1x1x8xf32> to vector<1x8xf32>
    %14 = vector.broadcast %13 : vector<1x8xf32> to vector<8x8xf32>
    %15 = arith.addf %11, %14 : vector<8x8xf32>
    %c2 = arith.constant 2 : index
    %c0_18 = arith.constant 0 : index
    %c0_19 = arith.constant 0 : index
    %c0_20 = arith.constant 0 : index
    %16 = vector.load %arg3[%c2, %c0_18, %c0_19, %c0_20] : memref<3x1x32x8xbf16, #tpu.memory_space<vmem>>, vector<1x1x32x8xbf16>
    %17 = vector.shape_cast %16 : vector<1x1x32x8xbf16> to vector<32x8xbf16>
    %cst_21 = arith.constant dense<0.000000e+00> : vector<8x8xf32>
    %18 = tpu.matmul %1, %17, %cst_21 {dimension_numbers = #tpu.dot_dimension_numbers<[1], [0], [0], [1], [0, 0, 1, 1], [], []>} : vector<8x32xbf16>, vector<32x8xbf16>, vector<8x8xf32> -> vector<8x8xf32>
    %c2_22 = arith.constant 2 : index
    %c0_23 = arith.constant 0 : index
    %c0_24 = arith.constant 0 : index
    %c0_25 = arith.constant 0 : index
    %19 = vector.load %arg4[%c2_22, %c0_23, %c0_24, %c0_25] : memref<3x1x1x8xf32, #tpu.memory_space<vmem>>, vector<1x1x1x8xf32>
    %20 = vector.shape_cast %19 : vector<1x1x1x8xf32> to vector<1x8xf32>
    %21 = vector.broadcast %20 : vector<1x8xf32> to vector<8x8xf32>
    %22 = arith.addf %18, %21 : vector<8x8xf32>
    %23 = arith.truncf %8 : vector<8x8xf32> to vector<8x8xbf16>
    %24 = arith.truncf %15 : vector<8x8xf32> to vector<8x8xbf16>
    %cst_26 = arith.constant dense<0.000000e+00> : vector<8x8xf32>
    %25 = tpu.matmul %23, %24, %cst_26 {dimension_numbers = #tpu.dot_dimension_numbers<[1], [1], [0], [0], [0, 0, 1, 0], [], []>} : vector<8x8xbf16>, vector<8x8xbf16>, vector<8x8xf32> -> vector<8x8xf32>
    %cst_27 = arith.constant dense<0xFF800000> : vector<8xf32>
    %26 = vector.multi_reduction <maximumf>, %25, %cst_27 [1] : vector<8x8xf32> to vector<8xf32>
    %27 = vector.shape_cast %26 : vector<8xf32> to vector<8x1xf32>
    %28 = vector.broadcast %27 : vector<8x1xf32> to vector<8x8xf32>
    %29 = arith.subf %25, %28 : vector<8x8xf32>
    %30 = math.exp %29 : vector<8x8xf32>
    %cst_28 = arith.constant dense<0.000000e+00> : vector<8xf32>
    %31 = vector.multi_reduction <add>, %30, %cst_28 [1] : vector<8x8xf32> to vector<8xf32>
    %32 = vector.shape_cast %31 : vector<8xf32> to vector<8x1xf32>
    %33 = tpu.reciprocal %32 {approx = true} : vector<8x1xf32> -> vector<8x1xf32>
    %34 = vector.broadcast %33 : vector<8x1xf32> to vector<8x8xf32>
    %35 = arith.mulf %30, %34 : vector<8x8xf32>
    %36 = arith.truncf %35 : vector<8x8xf32> to vector<8x8xbf16>
    %37 = arith.truncf %22 : vector<8x8xf32> to vector<8x8xbf16>
    %cst_29 = arith.constant dense<0.000000e+00> : vector<8x8xf32>
    %38 = tpu.matmul %36, %37, %cst_29 {dimension_numbers = #tpu.dot_dimension_numbers<[1], [0], [0], [1], [0, 0, 1, 1], [], []>} : vector<8x8xbf16>, vector<8x8xbf16>, vector<8x8xf32> -> vector<8x8xf32>
    %39 = arith.truncf %38 : vector<8x8xf32> to vector<8x8xbf16>
    %c0_30 = arith.constant 0 : index
    %c0_31 = arith.constant 0 : index
    %c0_32 = arith.constant 0 : index
    %40 = vector.load %arg5[%c0_30, %c0_31, %c0_32] : memref<1x8x32xbf16, #tpu.memory_space<vmem>>, vector<1x8x32xbf16>
    %41 = vector.shape_cast %40 : vector<1x8x32xbf16> to vector<8x32xbf16>
    %cst_33 = arith.constant dense<0.000000e+00> : vector<8x32xf32>
    %42 = tpu.matmul %39, %41, %cst_33 {dimension_numbers = #tpu.dot_dimension_numbers<[1], [0], [0], [1], [0, 0, 1, 1], [], []>} : vector<8x8xbf16>, vector<8x32xbf16>, vector<8x32xf32> -> vector<8x32xf32>
    %c0_i32 = arith.constant 0 : i32
    %43 = arith.cmpi eq, %arg1, %c0_i32 : i32
    %44 = arith.extui %43 : i1 to i32
    %c0_i32_34 = arith.constant 0 : i32
    %45 = arith.cmpi ne, %44, %c0_i32_34 : i32
    scf.if %45 {
      %c0_37 = arith.constant 0 : index
      %c0_38 = arith.constant 0 : index
      %49 = vector.load %arg6[%c0_37, %c0_38] : memref<1x32xf32, #tpu.memory_space<vmem>>, vector<1x32xf32>
      %50 = vector.broadcast %49 : vector<1x32xf32> to vector<8x32xf32>
      %51 = arith.addf %42, %50 : vector<8x32xf32>
      %c0_39 = arith.constant 0 : index
      %c0_40 = arith.constant 0 : index
      %c0_41 = arith.constant 0 : index
      %52 = vector.load %arg7[%c0_39, %c0_40, %c0_41] : memref<1x8x32xf32, #tpu.memory_space<vmem>>, vector<1x8x32xf32>
      %53 = vector.shape_cast %52 : vector<1x8x32xf32> to vector<8x32xf32>
      %54 = vector.shape_cast %51 : vector<8x32xf32> to vector<1x8x32xf32>
      tpu.vector_store %arg7[%c0_39, %c0_40, %c0_41], %54 {strides = array<i32>} : memref<1x8x32xf32, #tpu.memory_space<vmem>>, vector<1x8x32xf32>,
    } else {
    }
    %c0_i32_35 = arith.constant 0 : i32
    %46 = arith.cmpi sgt, %arg1, %c0_i32_35 : i32
    %47 = arith.extui %46 : i1 to i32
    %c0_i32_36 = arith.constant 0 : i32
    %48 = arith.cmpi ne, %47, %c0_i32_36 : i32
    scf.if %48 {
      %c0_37 = arith.constant 0 : index
      %c0_38 = arith.constant 0 : index
      %c0_39 = arith.constant 0 : index
      %49 = vector.load %arg7[%c0_37, %c0_38, %c0_39] : memref<1x8x32xf32, #tpu.memory_space<vmem>>, vector<1x8x32xf32>
      %50 = vector.shape_cast %49 : vector<1x8x32xf32> to vector<8x32xf32>
      %51 = arith.addf %50, %42 : vector<8x32xf32>
      %c0_40 = arith.constant 0 : index
      %c0_41 = arith.constant 0 : index
      %c0_42 = arith.constant 0 : index
      %52 = vector.load %arg7[%c0_40, %c0_41, %c0_42] : memref<1x8x32xf32, #tpu.memory_space<vmem>>, vector<1x8x32xf32>
      %53 = vector.shape_cast %52 : vector<1x8x32xf32> to vector<8x32xf32>
      %54 = vector.shape_cast %51 : vector<8x32xf32> to vector<1x8x32xf32>
      tpu.vector_store %arg7[%c0_40, %c0_41, %c0_42], %54 {strides = array<i32>} : memref<1x8x32xf32, #tpu.memory_space<vmem>>, vector<1x8x32xf32>,
    } else {
    }
    return
  }
  func.func @transform_0(%arg0: i32, %arg1: i32) -> (i32, i32, i32) {
    %c0_i32 = arith.constant 0 : i32
    %c0_i32_0 = arith.constant 0 : i32
    %c0_i32_1 = arith.constant 0 : i32
    return %arg0, %c0_i32, %c0_i32_0 : i32, i32, i32
  }
  func.func @transform_1(%arg0: i32, %arg1: i32) -> (i32, i32, i32, i32) {
    %c0_i32 = arith.constant 0 : i32
    %c0_i32_0 = arith.constant 0 : i32
    %c0_i32_1 = arith.constant 0 : i32
    %c0_i32_2 = arith.constant 0 : i32
    return %c0_i32, %arg1, %c0_i32_0, %c0_i32_1 : i32, i32, i32, i32
  }
  func.func @transform_2(%arg0: i32, %arg1: i32) -> (i32, i32, i32, i32) {
    %c0_i32 = arith.constant 0 : i32
    %c0_i32_0 = arith.constant 0 : i32
    %c0_i32_1 = arith.constant 0 : i32
    %c0_i32_2 = arith.constant 0 : i32
    return %c0_i32, %arg1, %c0_i32_0, %c0_i32_1 : i32, i32, i32, i32
  }
  func.func @transform_3(%arg0: i32, %arg1: i32) -> (i32, i32, i32) {
    %c0_i32 = arith.constant 0 : i32
    %c0_i32_0 = arith.constant 0 : i32
    %c0_i32_1 = arith.constant 0 : i32
    return %arg1, %c0_i32, %c0_i32_0 : i32, i32, i32
  }
  func.func @transform_4(%arg0: i32, %arg1: i32) -> (i32, i32) {
    %c0_i32 = arith.constant 0 : i32
    %c0_i32_0 = arith.constant 0 : i32
    %c0_i32_1 = arith.constant 0 : i32
    return %c0_i32, %c0_i32_0 : i32, i32
  }
  func.func @transform_5(%arg0: i32, %arg1: i32) -> (i32, i32, i32) {
    %c0_i32 = arith.constant 0 : i32
    %c0_i32_0 = arith.constant 0 : i32
    %c0_i32_1 = arith.constant 0 : i32
    return %arg0, %c0_i32, %c0_i32_0 : i32, i32, i32
  }
}

</mosaic_0001>

<bundles_post_ra>
// kernel: mha_forward.1
= control target key start
LH: loop header
LB: loop body
LE: loop exit
PB: predicated region body
PF: predicated region fallthrough
CT: control target
= control target key end

     0   :  { %s1160_s18 = smov 0   ;;  %s1162_s19 = smov 0   ;;  %s1311_s0 = inlined_call_operand.vmem [shape: bf16[2,8,32], index: 0, kind: input, shape index: {}]   ;;  %s1312_s1 = inlined_call_operand.vmem [shape: bf16[3,4,32,8], index: 1, kind: input, shape index: {}]   ;;  %s1313_s2 = inlined_call_operand.vmem [shape: f32[3,4,1,8], index: 2, kind: input, shape index: {}]   ;;  %s1314_s3 = inlined_call_operand.vmem [shape: bf16[4,8,32], index: 3, kind: input, shape index: {}]   ;;  %s1315_s4 = inlined_call_operand.vmem [shape: f32[1,32], index: 4, kind: input, shape index: {}]   ;;  %s1316_s5 = inlined_call_operand.vmem [shape: f32[2,8,32], index: 5, kind: output, shape index: {}]  }
   0x1   :  { %s1164_s20 = smov 0   ;;  %s1166_s21 = smov 0  }
   0x2   :  { %s1168_s22 = smov 0   ;;  %s1170_s23 = smov 0  }
   0x3   :  { %s1172_s24 = smov 0  }
   0x4 LB: > { %s24_s25 = sadd.s32 1, %s1118_s22  ;;  %s27_s26 = sadd.s32 1, %s1122_s23  ;;  %s1126_s24 = sphi %s1172_s24, %s15_s24   ;;  %s1122_s23 = sphi %s1170_s23, %s1323_s23   ;;  %s1118_s22 = sphi %s1168_s22, %s1322_s22   ;;  %s1114_s21 = sphi %s1166_s21, %s1321_s21   ;;  %s1110_s20 = sphi %s1164_s20, %s1320_s20   ;;  %s1106_s19 = sphi %s1162_s19, %s1319_s19   ;;  %s1102_s18 = sphi %s1160_s18, %s1318_s18  }
   0x5   : > { %p25_p0 = scmp.ge.s32.totalorder %s24_s25, 4  ;;  %s60_s27 = sadd.s32 1, %s1106_s19 }
   0x6   : > { %p67_p1 = scmp.ne.s32.totalorder %s1106_s19, %s1102_s18  ;;  %p68_p2 = scmp.eq.s32.totalorder %s1126_s24, 0 }
   0x7   : > { %s1325_s25 = smov (%p25_p0, %s24_s25), 0  ;;  %s1327_s26 = smov (!%p25_p0, %s27_s26), %s1122_s23 }
   0x8   : > { %s57_s28 = ssub.s32 %s1118_s22, %s1325_s25  ;;  %p1206_p3 = por %p68_p2, %p67_p1 }
   0x9   : > { %p29_p4 = scmp.ge.s32.totalorder %s1327_s26, 2  ;;  %p58_p5 = scmp.eq.s32.totalorder %s57_s28, 0 }
   0xa   : > { %p905_p6 = scmp.ge.s32.totalorder %s1126_s24, 8 }
   0xb   : > { %s1329_s26 = smov (%p29_p4, %s1327_s26), 0 }
   0xc   : > { %s1213_s30 = scalar_select %p58_p5, %s1106_s19, %s60_s27  }
   0xd   : > { %195 = sbr.rel (%p905_p6) target bundleno = 34 (0x22), region = 20 }
  0x14   : > { %205 = sbr.rel (!%p1206_p3) target bundleno = 27 (0x1b), region = 28  ;;  %s207_s6 = sand.u32 (%p1206_p3), 1, %s1106_s19  }
  0x15   : > { %s942_s7 = sshll.u32 (%p1206_p3), %s1118_s22, 4  ;;  %s1000_s8 = smul.u32 (%p1206_p3), 48, %s207_s6 }
  0x16   : > { %s212_s11 = scalar_lea.vmem (%p1206_p3), %s1312_s1, %s942_s7 }
  0x17   : > { %v228_v0 = vld [vmem:[%s212_s11] sm:$0xff] (%p1206_p3)   ;;  %v232_v1 = vld [vmem:[%s212_s11 + $0x8] sm:$0xff] (%p1206_p3)   ;;  %s209_s12 = scalar_lea.vmem (%p1206_p3), [#allocation2], %s1000_s8 }
  0x18   : > { %v236_v2 = vld [vmem:[%s212_s11 + $0x40] sm:$0xff] (%p1206_p3)   ;;  %v240_v3 = vld [vmem:[%s212_s11 + $0x48] sm:$0xff] (%p1206_p3)   ;;  %229 = vst [vmem:[%s209_s12] sm:$0xff] (%p1206_p3), %v228_v0   ;;  %233 = vst [vmem:[%s209_s12 + $0x8] sm:$0xff] (%p1206_p3), %v232_v1  }
  0x19   : > { %v244_v4 = vld [vmem:[%s212_s11 + $0x80] sm:$0xff] (%p1206_p3)   ;;  %v248_v5 = vld [vmem:[%s212_s11 + $0x88] sm:$0xff] (%p1206_p3)   ;;  %237 = vst [vmem:[%s209_s12 + $0x10] sm:$0xff] (%p1206_p3), %v236_v2   ;;  %241 = vst [vmem:[%s209_s12 + $0x18] sm:$0xff] (%p1206_p3), %v240_v3  }
  0x1a   : > { %245 = vst [vmem:[%s209_s12 + $0x20] sm:$0xff] (%p1206_p3), %v244_v4   ;;  %249 = vst [vmem:[%s209_s12 + $0x28] sm:$0xff] (%p1206_p3), %v248_v5  }
  0x1b PF: > { %298 = sbr.rel (!%p1206_p3) target bundleno = 34 (0x22), region = 69  ;;  %s300_s13 = sand.u32 (%p1206_p3), 1, %s1106_s19  }
  0x1c   : > { %s303_s16 = scalar_lea.vmem (%p1206_p3), %s1313_s2, %s1118_s22  ;;  %s1001_s17 = smul.u32 (%p1206_p3), 3, %s300_s13 }
  0x1d   : > { %v319_v6 = vld [vmem:[%s303_s16] sm:$0x1] (%p1206_p3)  ;;  %v321_v7 = vld [vmem:[%s303_s16 + $0x4] sm:$0x1] (%p1206_p3)  ;;  %v323_v8 = vld [vmem:[%s303_s16 + $0x8] sm:$0x1] (%p1206_p3) }
  0x1e   : > { %s302_s27 = scalar_lea.vmem (%p1206_p3), [#allocation3], %s1001_s17 }
  0x1f   : > { %320 = vst [vmem:[%s302_s27] sm:$0x1] (%p1206_p3), %v319_v6  ;;  %322 = vst [vmem:[%s302_s27 + $0x1] sm:$0x1] (%p1206_p3), %v321_v7 }
  0x20   : > { %324 = vst [vmem:[%s302_s27 + $0x2] sm:$0x1] (%p1206_p3), %v323_v8 }
  0x22 PF: > { %p908_p7 = scmp.ge.s32.totalorder %s1126_s24, 1  ;;  %p351_p8 = scmp.lt.s32.totalorder %s1126_s24, 9 }
  0x24   : > { %p352_p9 = pnand %p908_p7, %p351_p8 }
  0x25   : > { %s358_s28 = sand.u32 (!%p352_p9), 1, %s1102_s18   ;;  %p403_p10 = scmp.lt.s32.totalorder (!%p352_p9), %s1114_s21, 1  ;;  %v1128_v9 = vmov (!%p352_p9), 0.0   ;;  %vm1129_vm0 = vmmov (!%p352_p9), 0   ;;  %vm440_vm1 = vcmask (!%p352_p9), 261120   ;;  %vm616_vm2 = vcmask (!%p352_p9), 64512  }
  0x26   : > { %355 = sbr.rel (%p352_p9) target bundleno = 1241 (0x4d9), region = 107  ;;  %966 = vmatprep.subr.bf16.mxu1 (!%p352_p9), %v1128_v9  ;;  %958 = vmatprep.subr.bf16.mxu0 (!%p352_p9), %v1128_v9  ;;  %vm679_vm3 = vcmask (!%p352_p9), 1043456   ;;  %p407_p11 = scmp.lt.s32.totalorder (!%p352_p9), %s1110_s20, 3 }
  0x27   : > { %s1002_s29 = smul.u32 (!%p352_p9), 48, %s358_s28  ;;  %970 = vmatprep.mubr.msk.bf16.mxu1 (!%p352_p9), %vm1129_vm0, %v1128_v9  ;;  %962 = vmatprep.mubr.msk.bf16.mxu0 (!%p352_p9), %vm1129_vm0, %v1128_v9  ;;  %p937_p12 = scmp.ne.s32.totalorder (!%p352_p9), %s1110_s20, 0 }
  0x29   : > { %s1239_s6 = scalar_lea.vmem (!%p352_p9), [#allocation2], %s1002_s29 }
  0x2a   : > { %v1062_v10 = vld [vmem:[%s1239_s6 + $0x10] sm:$0xff] (!%p352_p9)   ;;  %v1063_v11 = vld [vmem:[%s1239_s6 + $0x18] sm:$0xff] (!%p352_p9)   ;;  %v1064_v12 = vld [vmem:[%s1239_s6] sm:$0xff] (!%p352_p9)  }
  0x2b   : > { %967 = vmatpush3.bf16.msra.mxu1 (!%p352_p9), %v1062_v10  ;;  %959 = vmatpush3.bf16.msra.mxu0 (!%p352_p9), %v1064_v12  ;;  %v1065_v13 = vld [vmem:[%s1239_s6 + $0x8] sm:$0xff] (!%p352_p9)   ;;  %v1066_v30 = vld [vmem:[%s1239_s6 + $0x20] sm:$0xff] (!%p352_p9)  }
  0x2c   : > { %968 = vmatprep.subr.bf16.mxu1 (!%p352_p9), %v1128_v9  ;;  %960 = vmatprep.subr.bf16.mxu0 (!%p352_p9), %v1128_v9  ;;  %v1067_v31 = vld [vmem:[%s1239_s6 + $0x28] sm:$0xff] (!%p352_p9)  }
  0x2d   : > { %s1331_s21 = smov (!%p403_p10, %s1114_s21), 1  ;;  %v938_v1 = vld [vmem:[%s1315_s4] ss:$0 sm:$0xff] (!%p937_p12) }
  0x2e   : > { %s909_s7 = sshll.u32 %s1331_s21, 2  ;;  %s911_s8 = sshll.u32 %s1331_s21, 3 }
  0x2f   : > { %s1247_s11 = scalar_lea.vmem %s1316_s5, %s911_s8  ;;  %s406_s14 = scalar_lea.vmem %s1311_s0, %s909_s7  ;;  %969 = vmatpush3.bf16.msra.mxu1 %v1063_v11  ;;  %961 = vmatpush3.bf16.msra.mxu0 %v1065_v13 }
  0x30   : > { %v416_v14 = vld [vmem:[%s406_s14] sm:$0xf]  ;;  %982 = vmatprep.subr.bf16.mxu1 %v1128_v9  ;;  %974 = vmatprep.subr.bf16.mxu0 %v1128_v9  ;;  %s1003_s21 = smul.u32 3, %s358_s28 }
  0x31   : > { %s408_s18 = scalar_select %p407_p11, %s1110_s20, 3 }
  0x32   : > { %971 = vmatmul.mubr.msk.bf16.vlgmr.msra.gmra.mrb[0].mxu1 %vm440_vm1, %v416_v14  ;;  %963 = vmatmul.mubr.msk.bf16.vlgmr.msra.gmra.mrb[0].mxu0 %vm440_vm1, %v416_v14  ;;  %s1259_s15 = scalar_lea.vmem [#allocation3], %s1003_s21 }
  0x33   : > { %984 = vmatprep.mubr.msk.bf16.mxu1 %vm1129_vm0, %v1128_v9  ;;  %978 = vmatprep.mubr.msk.bf16.mxu0 %vm1129_vm0, %v1128_v9  ;;  %v921_v15 = vld [vmem:[%s1259_s15 + $0x1] ss:$0 sm:$0xff]  ;;  %v912_v20 = vld [vmem:[%s1259_s15] ss:$0 sm:$0xff]  ;;  %v930_v45 = vld [vmem:[%s1259_s15 + $0x2] ss:$0 sm:$0xff] }
  0x34   : > { %975 = vmatpush3.bf16.msra.mxu0 %v1066_v30  ;;  %s910_s16 = sshll.u32 %s408_s18, 2 }
  0x35   : > { %976 = vmatprep.subr.bf16.mxu0 %v1128_v9  ;;  %s410_s28 = scalar_lea.vmem %s1314_s3, %s910_s16 }
  0x36   : > { %v724_v50 = vld [vmem:[%s410_s28] sm:$0xf] }
  0x37   : > { %v729_v51 = vsel %vm679_vm3, %v724_v50, 0 }
  0x38   : > { %977 = vmatpush3.bf16.msra.mxu0 %v1067_v31 }
  0x39   : > { %988 = vmatprep.subr.bf16.mxu0 %v1128_v9 }
  0x3b   : > { %979 = vmatmul.mubr.msk.bf16.vlgmr.msra.gmra.mrb[4].mxu0 %vm440_vm1, %v416_v14 }
  0x3c   : > { %990 = vmatprep.mubr.msk.bf16.mxu0 %vm1129_vm0, %v1128_v9 }
 0x105   : > { %v543_v16 = vpop.f32.mrb[0].mxu1  ;;  %v478_v21 = vpop.f32.mrb[0].mxu0 }
 0x106   : > { %v544_v17 = vadd.f32 %v921_v15, %v543_v16  ;;  %v972_v18 = vpop.f32.mrb[1].mxu1  ;;  %v964_v24 = vpop.f32.mrb[1].mxu0  ;;  %v479_v27 = vadd.f32 %v912_v20, %v478_v21 }
 0x107   : > { %v546_v19 = vpop.f32.mrb[2].mxu1  ;;  %v481_v25 = vpop.f32.mrb[2].mxu0 }
 0x108   : > { %v615_v22 = vpack.c.bf16 %v544_v17, %v544_v17  ;;  %v973_v23 = vpop.f32.mrb[3].mxu1  ;;  %v965_v28 = vpop.f32.mrb[3].mxu0  ;;  %v614_v29 = vpack.c.bf16 %v479_v27, %v479_v27 }
 0x10a   : > { %v621_v26 = vsel %vm616_vm2, %v615_v22, 0 }
 0x10b   : > { %983 = vmatpush3.bf16.xpose.msra.mxu1 %v621_v26 }
 0x10c   : > { %994 = vmatprep.subr.bf16.mxu1 %v1128_v9 }
 0x10e   : > { %v608_v42 = vpop.f32.mrb[4].mxu0 }
 0x10f   : > { %v980_v43 = vpop.f32.mrb[5].mxu0  ;;  %v609_v47 = vadd.f32 %v930_v45, %v608_v42 }
 0x110   : > { %v611_v44 = vpop.f32.mrb[6].mxu0 }
 0x111   : > { %v981_v46 = vpop.f32.mrb[7].mxu0  ;;  %v675_v48 = vpack.c.bf16 %v609_v47, %v609_v47 }
 0x112   : > { %985 = vmatmul.mubr.msk.bf16.vlgmr.msra.gmra.mrb[4].mxu1 %vm616_vm2, %v614_v29 }
 0x113   : > { %996 = vmatprep.mubr.msk.bf16.mxu1 %vm1129_vm0, %v1128_v9  ;;  %v681_v49 = vsel %vm679_vm3, %v675_v48, 0  ;;  %995 = vmatpush3.bf16.msra.mxu1 %v729_v51 }
 0x114   : > { %989 = vmatpush3.bf16.msra.mxu0 %v681_v49 }
 0x1e5   : > { %v657_v32 = vpop.f32.mrb[4].mxu1 }
 0x1e6   : > { %v986_v33 = vpop.f32.mrb[5].mxu1  ;;  %v663_v34 = vsel %vm616_vm2, %v657_v32, -inf }
 0x1e7   : > { %664 = vmax.xlane.f32.xlu0 %v663_v34  ;;  %v660_v35 = vpop.f32.mrb[6].mxu1 }
 0x1e8   : > { %v987_v36 = vpop.f32.mrb[7].mxu1 }
 0x274   : > { %v665_v37 = vpop.xlane.xlu0 %664 }
 0x275   : > { %v666_v38 = vsub.f32 %v657_v32, %v665_v37 }
 0x277   : > { %v667_v39 = vmul.f32 1.442695, %v666_v38 }
 0x279   : > { %1068 = vpow2.f32 %v667_v39 }
 0x283   : > { %v1069_v40 = vpop.eup %1068 }
 0x284   : > { %v669_v41 = vsel %vm616_vm2, %v1069_v40, 0.0 }
 0x285   : > { %670 = vadd.xlane.f32.xlu0 %v669_v41 }
 0x312   : > { %v671_v52 = vpop.xlane.xlu0 %670 }
 0x313   : > { %1070 = vrcp.f32 %v671_v52 }
 0x31d   : > { %v1071_v53 = vpop.eup %1070 }
 0x31e   : > { %v673_v54 = vmul.f32 %v1071_v53, %v1069_v40 }
 0x320   : > { %v674_v55 = vpack.c.bf16 %v673_v54, %v673_v54 }
 0x322   : > { %991 = vmatmul.mubr.msk.bf16.vlgmr.msra.gmra.mrb[8].mxu0 %vm616_vm2, %v674_v55 }
 0x3f5   : > { %v717_v56 = vpop.f32.mrb[8].mxu0 }
 0x3f6   : > { %v723_v57 = vpack.c.bf16 %v717_v56, %v717_v56  ;;  %v992_v58 = vpop.f32.mrb[9].mxu0 }
 0x3f7   : > { %v720_v59 = vpop.f32.mrb[10].mxu0 }
 0x3f8   : > { %v993_v60 = vpop.f32.mrb[11].mxu0  ;;  %997 = vmatmul.mubr.msk.bf16.vlgmr.msra.gmra.mrb[8].mxu1 %vm616_vm2, %v723_v57 }
 0x4c8   : > { %774 = sbr.rel (%p937_p12) target bundleno = 1231 (0x4cf), region = 119 }
 0x4cb   : > { %v765_v61 = vpop.f32.mrb[8].mxu1 }
 0x4cc   : > { %v998_v62 = vpop.f32.mrb[9].mxu1  ;;  %v782_v2 = vadd.f32 (!%p937_p12), %v938_v1, %v765_v61 }
 0x4cd   : > { %v768_v63 = vpop.f32.mrb[10].mxu1 }
 0x4ce   : > { %v999_v0 = vpop.f32.mrb[11].mxu1  ;;  %783 = vst.msk [vmem:[%s1247_s11] sm:$0xff] (!%p937_p12), %vm440_vm1, %v782_v2 }
 0x4cf PF: > { %p939_p13 = scmp.le.s32.totalorder %s1110_s20, 0 }
 0x4d1   : > { %787 = sbr.rel (%p939_p13) target bundleno = 1241 (0x4d9), region = 123 }
 0x4d5   : > { %v788_v3 = vld [vmem:[%s1247_s11] sm:$0xff] (!%p939_p13) }
 0x4d6   : > { %v789_v4 = vadd.f32 (!%p939_p13), %v788_v3, %v765_v61 }
 0x4d8   : > { %790 = vst.msk [vmem:[%s1247_s11] sm:$0xff] %vm440_vm1, %v789_v4 }
 0x4d9 PF: > { %s15_s24 = sadd.s32 1, %s1126_s24   ;;  %s1318_s18 = smov %s1106_s19 }
 0x4da   : > { %p12_p0 = scmp.ge.s32.totalorder %s15_s24, 10   ;;  %s1319_s19 = smov %s1213_s30 }
 0x4db   : > { %s1320_s20 = smov %s1118_s22  ;;  %s1321_s21 = smov %s1122_s23 }
 0x4dc   : > { %s1322_s22 = smov %s1325_s25  ;;  %s1323_s23 = smov %s1329_s26 }
 0x4dd   :  { %14 = sbr.rel (!%p12_p0) target bundleno = 4 (0x4), region = 176 }

</bundles_post_ra>
